<compile_context>
chip_gen: v6e
topology: v6e:2x2x1
jax: 0.10.0
libtpu: 0.0.40
codegen_flags: <defaults>
</compile_context>

<pallas_src>
import functools
import math

import jax
import jax.numpy as jnp
from jax.experimental import pallas as pl
from jax.experimental.pallas import tpu as pltpu

BN_EPS = 1e-5


def _round_up(x, m):
    return ((x + m - 1) // m) * m


def _pick_tm(m, tm_max=1024):
    """Largest multiple-of-128 M tile <= tm_max that still yields >= 2 grid
    tiles (keeps both v7x TensorCores busy); degenerates to 128 for tiny M."""
    m_pad = _round_up(m, 128)
    half = 128 * ((m_pad // 2) // 128)
    return int(min(tm_max, max(128, half)))


def _pad_last(a, target):
    pad = target - a.shape[-1]
    if pad == 0:
        return a
    return jnp.pad(a, [(0, 0)] * (a.ndim - 1) + [(0, pad)])


# ---------------------------------------------------------------------------
# Pallas kernels
# ---------------------------------------------------------------------------
def _make_matmul_stats_kernel(n_mm):
    """Pass 1: for each (W, P) pair compute Y = W @ P (f32 MXU accumulate),
    emit per-channel partial (sum, sumsq) over this M tile (f32), and store Y
    as bf16 (intermediate is written once and read once by pass 2)."""

    def kernel(*refs):
        # refs: w_0, p_0, ..., w_{n-1}, p_{n-1}, y_0, st_0, ..., y_{n-1}, st_{n-1}
        for t in range(n_mm):
            w_ref = refs[2 * t]
            p_ref = refs[2 * t + 1]
            y_ref = refs[2 * n_mm + 2 * t]
            st_ref = refs[2 * n_mm + 2 * t + 1]

            y = jnp.dot(w_ref[...], p_ref[...],
                        preferred_element_type=jnp.float32)       # (Cp, tm) f32
            s = jnp.sum(y, axis=1, keepdims=True)                  # (Cp, 1)
            ss = jnp.sum(y * y, axis=1, keepdims=True)             # (Cp, 1)
            st_ref[0] = jnp.concatenate([s, ss], axis=1)           # (Cp, 2)
            y_ref[...] = y.astype(y_ref.dtype)                     # bf16 store

    return kernel


def _make_bn_epilogue_kernel(n_bn, has_identity, apply_relu):
    """Pass 2: out = [relu]( sum_t (y_t * scale_t + offset_t) [+ identity] )."""

    def kernel(*refs):
        out_ref = refs[-1]
        acc = None
        idx = 0
        for _ in range(n_bn):
            y = refs[idx][...].astype(jnp.float32)   # bf16 -> f32 in-register
            sc = refs[idx + 1][...]
            of = refs[idx + 2][...]
            idx += 3
            term = y * sc + of          # folded BN: 1 mul + 1 add per element
            acc = term if acc is None else acc + term
        if has_identity:
            acc = acc + refs[idx][...].astype(jnp.float32)
        if apply_relu:
            acc = jnp.maximum(acc, 0.0)
        out_ref[...] = acc.astype(out_ref.dtype)

    return kernel


# ---------------------------------------------------------------------------
# pallas_call wrappers
# ---------------------------------------------------------------------------
def fused_matmul_stats(pairs, m_pad, tm):
    """pairs: list of (W (Cp, K) bf16, P (K, m_pad) bf16).
    Returns list of (Y (Cp, m_pad) bf16, stats (ntiles, Cp, 2) f32)."""
    n_mm = len(pairs)
    ntiles = m_pad // tm
    cp = pairs[0][0].shape[0]

    args, in_specs, out_shapes, out_specs = [], [], [], []
    flops = 0
    bytes_acc = 0
    k_max = 0
    for w, p in pairs:
        cp, k = w.shape
        k_max = max(k_max, k)
        args += [w, p]
        in_specs += [
            pl.BlockSpec((cp, k), lambda i: (0, 0)),
            pl.BlockSpec((k, tm), lambda i: (0, i)),
        ]
        out_shapes += [
            jax.ShapeDtypeStruct((cp, m_pad), jnp.bfloat16),
            jax.ShapeDtypeStruct((ntiles, cp, 2), jnp.float32),
        ]
        out_specs += [
            pl.BlockSpec((cp, tm), lambda i: (0, i)),
            pl.BlockSpec((1, cp, 2), lambda i: (i, 0, 0)),
        ]
        flops += 2 * cp * k * m_pad
        bytes_acc += (w.size + p.size) * 2 + cp * m_pad * 2 + ntiles * cp * 2 * 4

    # Per-step footprint: double-buffered P/Y/stat blocks + resident W, per pair.
    need = n_mm * (2 * (k_max * tm * 2 + cp * tm * 2 + 8 * 128 * 4)
                   + 2 * cp * k_max * 2)
    vmem_limit = int(min(64 << 20, max(32 << 20, 2 * need)))   # v7x-safe cap

    outs = pl.pallas_call(
        _make_matmul_stats_kernel(n_mm),
        grid=(ntiles,),
        in_specs=in_specs,
        out_specs=tuple(out_specs),
        out_shape=tuple(out_shapes),
        compiler_params=pltpu.CompilerParams(
            dimension_semantics=("parallel",),
            vmem_limit_bytes=vmem_limit),
        cost_estimate=pl.CostEstimate(flops=flops, transcendentals=0,
                                      bytes_accessed=bytes_acc),
    )(*args)
    return [(outs[2 * t], outs[2 * t + 1]) for t in range(n_mm)]


def fused_bn_epilogue(bn_terms, m_pad, tm, identity=None,
                      apply_relu=True, out_dtype=jnp.float32):
    """bn_terms: list of (Y (Cp, m_pad) bf16, scale (Cp,1) f32, offset (Cp,1) f32)."""
    cp = bn_terms[0][0].shape[0]
    ntiles = m_pad // tm

    args, in_specs = [], []
    for y, sc, of in bn_terms:
        args += [y, sc, of]
        in_specs += [
            pl.BlockSpec((cp, tm), lambda i: (0, i)),
            pl.BlockSpec((cp, 1), lambda i: (0, 0)),
            pl.BlockSpec((cp, 1), lambda i: (0, 0)),
        ]
    if identity is not None:
        args.append(identity)
        in_specs.append(pl.BlockSpec((cp, tm), lambda i: (0, i)))

    need = (len(bn_terms) * 2 * (cp * tm * 2 + 2 * 8 * 128 * 4)
            + (2 * cp * tm * 4 if identity is not None else 0)
            + 2 * cp * tm * 4)
    vmem_limit = int(min(64 << 20, max(32 << 20, 2 * need)))

    return pl.pallas_call(
        _make_bn_epilogue_kernel(len(bn_terms), identity is not None, apply_relu),
        grid=(ntiles,),
        in_specs=in_specs,
        out_specs=pl.BlockSpec((cp, tm), lambda i: (0, i)),
        out_shape=jax.ShapeDtypeStruct((cp, m_pad), out_dtype),
        compiler_params=pltpu.CompilerParams(
            dimension_semantics=("parallel",),
            vmem_limit_bytes=vmem_limit),
    )(*args)


# ---------------------------------------------------------------------------
# JAX-side glue: channel-major im2col, weight packing, BN fold, init
# ---------------------------------------------------------------------------
def im2col_cm(x_cnhw, kh, kw, stride, padding, dtype=jnp.bfloat16):
    """(C,N,H,W) -> patch matrix (K = kh*kw*C, M = N*Hout*Wout), built directly
    channel-major: no (M,K)->(K,M) transpose of the 9x-inflated matrix.
    K ordering (tap_i, tap_j, c) matches conv_weight_t."""
    C, N, H, W = x_cnhw.shape
    xp = jnp.pad(x_cnhw, ((0, 0), (0, 0), (padding, padding), (padding, padding)))
    Hout = (H + 2 * padding - kh) // stride + 1
    Wout = (W + 2 * padding - kw) // stride + 1
    taps = []
    for i in range(kh):
        for j in range(kw):
            taps.append(xp[:, :,
                           i:i + (Hout - 1) * stride + 1:stride,
                           j:j + (Wout - 1) * stride + 1:stride])
    p = jnp.stack(taps, axis=0).reshape(kh * kw * C, N * Hout * Wout)
    return p.astype(dtype), (Hout, Wout)


def conv_weight_t(w_oihw, cp, dtype=jnp.bfloat16):
    """PyTorch (Cout,Cin,KH,KW) -> (Cp, KH*KW*Cin) matching im2col (kh,kw,cin)."""
    cout = w_oihw.shape[0]
    wt = jnp.transpose(w_oihw, (0, 2, 3, 1)).reshape(cout, -1)
    wt = jnp.pad(wt, ((0, cp - cout), (0, 0)))
    return wt.astype(dtype)


def bn_scale_offset(stats, m_real, gamma_p, beta_p):
    """Reduce per-tile partials -> folded training-mode BN scale/offset.
    NOTE: one-pass E[y^2]-E[y]^2 on f32 partials; fine at these sizes but a
    shifted/Welford combine is safer for very large M."""
    tot = jnp.sum(stats, axis=0)                     # (Cp, 2)
    mean = tot[:, 0] / m_real
    var = jnp.maximum(tot[:, 1] / m_real - mean * mean, 0.0)   # biased variance
    inv = jax.lax.rsqrt(var + BN_EPS)
    scale = gamma_p * inv
    offset = beta_p - mean * scale
    return scale[:, None], offset[:, None]           # (Cp, 1) each


def init_conv_params(key, cout, cin, kh, kw):
    """Deterministic init mimicking PyTorch Conv2d default (uniform bounds)."""
    k_w, k_b = jax.random.split(key)
    fan_in = cin * kh * kw
    bound = 1.0 / math.sqrt(fan_in)
    w = jax.random.uniform(k_w, (cout, cin, kh, kw), jnp.float32, -bound, bound)
    b = jax.random.uniform(k_b, (cout,), jnp.float32, -bound, bound)
    return w, b


def init_bn_params(c):
    return jnp.ones((c,), jnp.float32), jnp.zeros((c,), jnp.float32)


# ---------------------------------------------------------------------------
# ResidualBlock forward
# ---------------------------------------------------------------------------
def residual_block_forward(x_nchw, params, kernel_size, stride, padding, tm_max=1024):
    N, Cin, H, W = x_nchw.shape
    Cout = params["w1"].shape[0]
    # Channel padding: full f32 sublanes (8).  For Cout=8 we keep Cp=8 even
    # though the Y/h intermediates are bf16 (sublane-masked stores cost less
    # than doubling intermediate HBM bytes); for Cout>8 pad to a full bf16
    # (16,128) sublane pack.
    Cp = _round_up(Cout, 16) if Cout > 8 else 8
    kh = kw = kernel_size

    g1 = _pad_last(params["g1"].astype(jnp.float32), Cp)
    be1 = _pad_last(params["be1"].astype(jnp.float32), Cp)
    g2 = _pad_last(params["g2"].astype(jnp.float32), Cp)
    be2 = _pad_last(params["be2"].astype(jnp.float32), Cp)

    x_cnhw = jnp.transpose(x_nchw, (1, 0, 2, 3))     # NCHW -> channel-major CNHW

    # ---- conv1 + bn1 + relu -------------------------------------------------
    # Conv biases are dropped on purpose — a per-channel bias before
    # training-mode BatchNorm is exactly cancelled by the mean subtraction.
    p1, (H1, W1) = im2col_cm(x_cnhw, kh, kw, stride, padding)
    M1 = N * H1 * W1
    tm1 = _pick_tm(M1, tm_max)
    m1_pad = _round_up(M1, tm1)
    p1 = _pad_last(p1, m1_pad)
    w1 = conv_weight_t(params["w1"], Cp)

    (y1, st1), = fused_matmul_stats([(w1, p1)], m1_pad, tm1)
    sc1, of1 = bn_scale_offset(st1, M1, g1, be1)
    h = fused_bn_epilogue([(y1, sc1, of1)], m1_pad, tm1,
                          apply_relu=True, out_dtype=jnp.bfloat16)
    # h is already channel-major (Cp, m1_pad): conv2's im2col consumes it
    # directly — no transpose / NHWC round trip.
    h_cnhw = h[:Cout, :M1].reshape(Cout, N, H1, W1)

    # ---- conv2 (+ fused 1x1 shortcut) + bn2 + add + relu ---------------------
    p2, (H2, W2) = im2col_cm(h_cnhw, kh, kw, stride, padding)
    M2 = N * H2 * W2
    tm2 = _pick_tm(M2, tm_max)
    m2_pad = _round_up(M2, tm2)
    p2 = _pad_last(p2, m2_pad)
    w2 = conv_weight_t(params["w2"], Cp)

    if Cin != Cout:
        gs = _pad_last(params["gs"].astype(jnp.float32), Cp)
        bes = _pad_last(params["bes"].astype(jnp.float32), Cp)
        xs = x_cnhw[:, :, ::stride, ::stride]        # 1x1 conv input, stride s
        Ms = N * xs.shape[2] * xs.shape[3]
        # Same restriction as the PyTorch module: the residual add requires
        # matching spatial dims (stride > 1 breaks both implementations).
        assert Ms == M2, "shortcut / conv2 spatial mismatch (stride>1 breaks the block)"
        ps = _pad_last(xs.reshape(Cin, Ms).astype(jnp.bfloat16), m2_pad)
        ws = conv_weight_t(params["ws"], Cp)

        (y2, st2), (ysh, sth) = fused_matmul_stats([(w2, p2), (ws, ps)], m2_pad, tm2)
        sc2, of2 = bn_scale_offset(st2, M2, g2, be2)
        scs, ofs = bn_scale_offset(sth, Ms, gs, bes)
        out = fused_bn_epilogue([(y2, sc2, of2), (ysh, scs, ofs)], m2_pad, tm2,
                                apply_relu=True, out_dtype=jnp.float32)
    else:
        # Identity shortcut: valid when conv2 preserves spatial dims
        # (stride == 1, 'same' padding) — same restriction as PyTorch.
        assert M2 == N * H * W, "identity shortcut requires conv2 to preserve spatial dims"
        ident = x_cnhw.reshape(Cin, N * H * W).astype(jnp.float32)   # (Cin, M)
        ident = jnp.pad(ident, ((0, Cp - Cin), (0, 0)))
        ident = _pad_last(ident, m2_pad)

        (y2, st2), = fused_matmul_stats([(w2, p2)], m2_pad, tm2)
        sc2, of2 = bn_scale_offset(st2, M2, g2, be2)
        out = fused_bn_epilogue([(y2, sc2, of2)], m2_pad, tm2, identity=ident,
                                apply_relu=True, out_dtype=jnp.float32)

    out = out[:Cout, :M2].reshape(Cout, N, H2, W2)
    return jnp.transpose(out, (1, 0, 2, 3))          # CNHW -> NCHW


# ---------------------------------------------------------------------------
# Main
# ---------------------------------------------------------------------------
if __name__ == "__main__":
    # ResidualBlock(in_channels=4, out_channels=8, kernel_size=3, stride=1, padding=1)
    batch, in_channels, out_channels = 2, 4, 8
    kernel_size, stride, padding = 3, 1, 1
    spatial = 16

    root = jax.random.PRNGKey(0)
    k_x, k_c1, k_c2, k_cs = jax.random.split(root, 4)

    x = jax.random.normal(k_x, (batch, in_channels, spatial, spatial), jnp.float32)

    w1, b1 = init_conv_params(k_c1, out_channels, in_channels, kernel_size, kernel_size)
    w2, b2 = init_conv_params(k_c2, out_channels, out_channels, kernel_size, kernel_size)
    ws, bs = init_conv_params(k_cs, out_channels, in_channels, 1, 1)
    g1, be1 = init_bn_params(out_channels)
    g2, be2 = init_bn_params(out_channels)
    gs, bes = init_bn_params(out_channels)

    # b1/b2/bs exist for parameter parity with the PyTorch module but are not
    # consumed (bias before training-mode BN is a mathematical no-op).
    params = dict(w1=w1, g1=g1, be1=be1,
                  w2=w2, g2=g2, be2=be2,
                  ws=ws, gs=gs, bes=bes)

    fwd = jax.jit(functools.partial(residual_block_forward,
                                    kernel_size=kernel_size,
                                    stride=stride, padding=padding, tm_max=1024))
    out = fwd(x, params)
    jax.block_until_ready(out)

    assert out.shape == (batch, out_channels, spatial, spatial)
    assert bool(jnp.all(jnp.isfinite(out)))
    print("KERNEL_OK")
</pallas_src>

<mosaic_0001>
module attributes {stable_mosaic.version = 11 : i64} {
  func.func @kernel(%arg0: i32, %arg1: memref<8x256xbf16, #tpu.memory_space<vmem>>, %arg2: memref<8x1xf32, #tpu.memory_space<vmem>>, %arg3: memref<8x1xf32, #tpu.memory_space<vmem>>, %arg4: memref<8x256xbf16, #tpu.memory_space<vmem>>) attributes {dimension_semantics = [#tpu.dimension_semantics<parallel>], iteration_bounds = array<i64: 2>, scalar_prefetch = 0 : i64, scratch_operands = 0 : i64, tpu.core_type = #tpu.core_type<tc>, window_params = [{transform_indices = @transform_0, window_bounds = array<i64: 8, 256>}, {pipeline_mode = #tpu.pipeline_mode<synchronous>, transform_indices = @transform_1, window_bounds = array<i64: 8, 1>}, {pipeline_mode = #tpu.pipeline_mode<synchronous>, transform_indices = @transform_2, window_bounds = array<i64: 8, 1>}, {transform_indices = @transform_3, window_bounds = array<i64: 8, 256>}]} {
    %c0 = arith.constant 0 : index
    %c0_0 = arith.constant 0 : index
    %0 = vector.load %arg1[%c0, %c0_0] : memref<8x256xbf16, #tpu.memory_space<vmem>>, vector<8x256xbf16>
    %1 = arith.extf %0 : vector<8x256xbf16> to vector<8x256xf32>
    %c0_1 = arith.constant 0 : index
    %c0_2 = arith.constant 0 : index
    %2 = vector.load %arg2[%c0_1, %c0_2] : memref<8x1xf32, #tpu.memory_space<vmem>>, vector<8x1xf32>
    %c0_3 = arith.constant 0 : index
    %c0_4 = arith.constant 0 : index
    %3 = vector.load %arg3[%c0_3, %c0_4] : memref<8x1xf32, #tpu.memory_space<vmem>>, vector<8x1xf32>
    %4 = vector.broadcast %2 : vector<8x1xf32> to vector<8x256xf32>
    %5 = arith.mulf %1, %4 : vector<8x256xf32>
    %6 = vector.broadcast %3 : vector<8x1xf32> to vector<8x256xf32>
    %7 = arith.addf %5, %6 : vector<8x256xf32>
    %cst = arith.constant 0.000000e+00 : f32
    %8 = vector.broadcast %cst : f32 to vector<8x256xf32>
    %9 = arith.maximumf %7, %8 : vector<8x256xf32>
    %10 = arith.truncf %9 : vector<8x256xf32> to vector<8x256xbf16>
    %c0_5 = arith.constant 0 : index
    %c0_6 = arith.constant 0 : index
    %11 = vector.load %arg4[%c0_5, %c0_6] : memref<8x256xbf16, #tpu.memory_space<vmem>>, vector<8x256xbf16>
    tpu.vector_store %arg4[%c0_5, %c0_6], %10 {strides = array<i32>} : memref<8x256xbf16, #tpu.memory_space<vmem>>, vector<8x256xbf16>,
    return
  }
  func.func @transform_0(%arg0: i32) -> (i32, i32) {
    %c0_i32 = arith.constant 0 : i32
    %c0_i32_0 = arith.constant 0 : i32
    return %c0_i32, %arg0 : i32, i32
  }
  func.func @transform_1(%arg0: i32) -> (i32, i32) {
    %c0_i32 = arith.constant 0 : i32
    %c0_i32_0 = arith.constant 0 : i32
    %c0_i32_1 = arith.constant 0 : i32
    return %c0_i32, %c0_i32_0 : i32, i32
  }
  func.func @transform_2(%arg0: i32) -> (i32, i32) {
    %c0_i32 = arith.constant 0 : i32
    %c0_i32_0 = arith.constant 0 : i32
    %c0_i32_1 = arith.constant 0 : i32
    return %c0_i32, %c0_i32_0 : i32, i32
  }
  func.func @transform_3(%arg0: i32) -> (i32, i32) {
    %c0_i32 = arith.constant 0 : i32
    %c0_i32_0 = arith.constant 0 : i32
    return %c0_i32, %arg0 : i32, i32
  }
}

module attributes {stable_mosaic.version = 11 : i64} {
  func.func @kernel(%arg0: i32, %arg1: memref<8x36xbf16, #tpu.memory_space<vmem>>, %arg2: memref<36x256xbf16, #tpu.memory_space<vmem>>, %arg3: memref<8x256xbf16, #tpu.memory_space<vmem>>, %arg4: memref<1x8x2xf32, #tpu.memory_space<vmem>>) attributes {dimension_semantics = [#tpu.dimension_semantics<parallel>], iteration_bounds = array<i64: 2>, scalar_prefetch = 0 : i64, scratch_operands = 0 : i64, tpu.core_type = #tpu.core_type<tc>, window_params = [{pipeline_mode = #tpu.pipeline_mode<synchronous>, transform_indices = @transform_0, window_bounds = array<i64: 8, 36>}, {transform_indices = @transform_1, window_bounds = array<i64: 36, 256>}, {transform_indices = @transform_2, window_bounds = array<i64: 8, 256>}, {transform_indices = @transform_3, window_bounds = array<i64: 1, 8, 2>}]} {
    %c0 = arith.constant 0 : index
    %c0_0 = arith.constant 0 : index
    %0 = vector.load %arg1[%c0, %c0_0] : memref<8x36xbf16, #tpu.memory_space<vmem>>, vector<8x36xbf16>
    %c0_1 = arith.constant 0 : index
    %c0_2 = arith.constant 0 : index
    %1 = vector.load %arg2[%c0_1, %c0_2] : memref<36x256xbf16, #tpu.memory_space<vmem>>, vector<36x256xbf16>
    %cst = arith.constant dense<0.000000e+00> : vector<8x256xf32>
    %2 = tpu.matmul %0, %1, %cst {dimension_numbers = #tpu.dot_dimension_numbers<[1], [0], [0], [1], [0, 0, 1, 1], [], []>} : vector<8x36xbf16>, vector<36x256xbf16>, vector<8x256xf32> -> vector<8x256xf32>
    %cst_3 = arith.constant dense<0.000000e+00> : vector<8xf32>
    %3 = vector.multi_reduction <add>, %2, %cst_3 [1] : vector<8x256xf32> to vector<8xf32>
    %4 = vector.shape_cast %3 : vector<8xf32> to vector<8x1xf32>
    %5 = arith.mulf %2, %2 : vector<8x256xf32>
    %cst_4 = arith.constant dense<0.000000e+00> : vector<8xf32>
    %6 = vector.multi_reduction <add>, %5, %cst_4 [1] : vector<8x256xf32> to vector<8xf32>
    %7 = vector.shape_cast %6 : vector<8xf32> to vector<8x1xf32>
    %8 = tpu.concatenate %4, %7 in 1 : vector<8x1xf32>, vector<8x1xf32> -> vector<8x2xf32>
    %c0_5 = arith.constant 0 : index
    %c0_6 = arith.constant 0 : index
    %c0_7 = arith.constant 0 : index
    %9 = vector.load %arg4[%c0_5, %c0_6, %c0_7] : memref<1x8x2xf32, #tpu.memory_space<vmem>>, vector<1x8x2xf32>
    %10 = vector.shape_cast %9 : vector<1x8x2xf32> to vector<8x2xf32>
    %11 = vector.shape_cast %8 : vector<8x2xf32> to vector<1x8x2xf32>
    tpu.vector_store %arg4[%c0_5, %c0_6, %c0_7], %11 {strides = array<i32>} : memref<1x8x2xf32, #tpu.memory_space<vmem>>, vector<1x8x2xf32>,
    %12 = arith.truncf %2 : vector<8x256xf32> to vector<8x256xbf16>
    %c0_8 = arith.constant 0 : index
    %c0_9 = arith.constant 0 : index
    %13 = vector.load %arg3[%c0_8, %c0_9] : memref<8x256xbf16, #tpu.memory_space<vmem>>, vector<8x256xbf16>
    tpu.vector_store %arg3[%c0_8, %c0_9], %12 {strides = array<i32>} : memref<8x256xbf16, #tpu.memory_space<vmem>>, vector<8x256xbf16>,
    return
  }
  func.func @transform_0(%arg0: i32) -> (i32, i32) {
    %c0_i32 = arith.constant 0 : i32
    %c0_i32_0 = arith.constant 0 : i32
    %c0_i32_1 = arith.constant 0 : i32
    return %c0_i32, %c0_i32_0 : i32, i32
  }
  func.func @transform_1(%arg0: i32) -> (i32, i32) {
    %c0_i32 = arith.constant 0 : i32
    %c0_i32_0 = arith.constant 0 : i32
    return %c0_i32, %arg0 : i32, i32
  }
  func.func @transform_2(%arg0: i32) -> (i32, i32) {
    %c0_i32 = arith.constant 0 : i32
    %c0_i32_0 = arith.constant 0 : i32
    return %c0_i32, %arg0 : i32, i32
  }
  func.func @transform_3(%arg0: i32) -> (i32, i32, i32) {
    %c0_i32 = arith.constant 0 : i32
    %c0_i32_0 = arith.constant 0 : i32
    %c0_i32_1 = arith.constant 0 : i32
    return %arg0, %c0_i32, %c0_i32_0 : i32, i32, i32
  }
}

module attributes {stable_mosaic.version = 11 : i64} {
  func.func @kernel(%arg0: i32, %arg1: memref<8x72xbf16, #tpu.memory_space<vmem>>, %arg2: memref<72x256xbf16, #tpu.memory_space<vmem>>, %arg3: memref<8x4xbf16, #tpu.memory_space<vmem>>, %arg4: memref<4x256xbf16, #tpu.memory_space<vmem>>, %arg5: memref<8x256xbf16, #tpu.memory_space<vmem>>, %arg6: memref<1x8x2xf32, #tpu.memory_space<vmem>>, %arg7: memref<8x256xbf16, #tpu.memory_space<vmem>>, %arg8: memref<1x8x2xf32, #tpu.memory_space<vmem>>) attributes {dimension_semantics = [#tpu.dimension_semantics<parallel>], iteration_bounds = array<i64: 2>, scalar_prefetch = 0 : i64, scratch_operands = 0 : i64, tpu.core_type = #tpu.core_type<tc>, window_params = [{pipeline_mode = #tpu.pipeline_mode<synchronous>, transform_indices = @transform_0, window_bounds = array<i64: 8, 72>}, {transform_indices = @transform_1, window_bounds = array<i64: 72, 256>}, {pipeline_mode = #tpu.pipeline_mode<synchronous>, transform_indices = @transform_2, window_bounds = array<i64: 8, 4>}, {transform_indices = @transform_3, window_bounds = array<i64: 4, 256>}, {transform_indices = @transform_4, window_bounds = array<i64: 8, 256>}, {transform_indices = @transform_5, window_bounds = array<i64: 1, 8, 2>}, {transform_indices = @transform_6, window_bounds = array<i64: 8, 256>}, {transform_indices = @transform_7, window_bounds = array<i64: 1, 8, 2>}]} {
    %c0 = arith.constant 0 : index
    %c0_0 = arith.constant 0 : index
    %0 = vector.load %arg1[%c0, %c0_0] : memref<8x72xbf16, #tpu.memory_space<vmem>>, vector<8x72xbf16>
    %c0_1 = arith.constant 0 : index
    %c0_2 = arith.constant 0 : index
    %1 = vector.load %arg2[%c0_1, %c0_2] : memref<72x256xbf16, #tpu.memory_space<vmem>>, vector<72x256xbf16>
    %cst = arith.constant dense<0.000000e+00> : vector<8x256xf32>
    %2 = tpu.matmul %0, %1, %cst {dimension_numbers = #tpu.dot_dimension_numbers<[1], [0], [0], [1], [0, 0, 1, 1], [], []>} : vector<8x72xbf16>, vector<72x256xbf16>, vector<8x256xf32> -> vector<8x256xf32>
    %cst_3 = arith.constant dense<0.000000e+00> : vector<8xf32>
    %3 = vector.multi_reduction <add>, %2, %cst_3 [1] : vector<8x256xf32> to vector<8xf32>
    %4 = vector.shape_cast %3 : vector<8xf32> to vector<8x1xf32>
    %5 = arith.mulf %2, %2 : vector<8x256xf32>
    %cst_4 = arith.constant dense<0.000000e+00> : vector<8xf32>
    %6 = vector.multi_reduction <add>, %5, %cst_4 [1] : vector<8x256xf32> to vector<8xf32>
    %7 = vector.shape_cast %6 : vector<8xf32> to vector<8x1xf32>
    %8 = tpu.concatenate %4, %7 in 1 : vector<8x1xf32>, vector<8x1xf32> -> vector<8x2xf32>
    %c0_5 = arith.constant 0 : index
    %c0_6 = arith.constant 0 : index
    %c0_7 = arith.constant 0 : index
    %9 = vector.load %arg6[%c0_5, %c0_6, %c0_7] : memref<1x8x2xf32, #tpu.memory_space<vmem>>, vector<1x8x2xf32>
    %10 = vector.shape_cast %9 : vector<1x8x2xf32> to vector<8x2xf32>
    %11 = vector.shape_cast %8 : vector<8x2xf32> to vector<1x8x2xf32>
    tpu.vector_store %arg6[%c0_5, %c0_6, %c0_7], %11 {strides = array<i32>} : memref<1x8x2xf32, #tpu.memory_space<vmem>>, vector<1x8x2xf32>,
    %12 = arith.truncf %2 : vector<8x256xf32> to vector<8x256xbf16>
    %c0_8 = arith.constant 0 : index
    %c0_9 = arith.constant 0 : index
    %13 = vector.load %arg5[%c0_8, %c0_9] : memref<8x256xbf16, #tpu.memory_space<vmem>>, vector<8x256xbf16>
    tpu.vector_store %arg5[%c0_8, %c0_9], %12 {strides = array<i32>} : memref<8x256xbf16, #tpu.memory_space<vmem>>, vector<8x256xbf16>,
    %c0_10 = arith.constant 0 : index
    %c0_11 = arith.constant 0 : index
    %14 = vector.load %arg3[%c0_10, %c0_11] : memref<8x4xbf16, #tpu.memory_space<vmem>>, vector<8x4xbf16>
    %c0_12 = arith.constant 0 : index
    %c0_13 = arith.constant 0 : index
    %15 = vector.load %arg4[%c0_12, %c0_13] : memref<4x256xbf16, #tpu.memory_space<vmem>>, vector<4x256xbf16>
    %cst_14 = arith.constant dense<0.000000e+00> : vector<8x256xf32>
    %16 = tpu.matmul %14, %15, %cst_14 {dimension_numbers = #tpu.dot_dimension_numbers<[1], [0], [0], [1], [0, 0, 1, 1], [], []>} : vector<8x4xbf16>, vector<4x256xbf16>, vector<8x256xf32> -> vector<8x256xf32>
    %cst_15 = arith.constant dense<0.000000e+00> : vector<8xf32>
    %17 = vector.multi_reduction <add>, %16, %cst_15 [1] : vector<8x256xf32> to vector<8xf32>
    %18 = vector.shape_cast %17 : vector<8xf32> to vector<8x1xf32>
    %19 = arith.mulf %16, %16 : vector<8x256xf32>
    %cst_16 = arith.constant dense<0.000000e+00> : vector<8xf32>
    %20 = vector.multi_reduction <add>, %19, %cst_16 [1] : vector<8x256xf32> to vector<8xf32>
    %21 = vector.shape_cast %20 : vector<8xf32> to vector<8x1xf32>
    %22 = tpu.concatenate %18, %21 in 1 : vector<8x1xf32>, vector<8x1xf32> -> vector<8x2xf32>
    %c0_17 = arith.constant 0 : index
    %c0_18 = arith.constant 0 : index
    %c0_19 = arith.constant 0 : index
    %23 = vector.load %arg8[%c0_17, %c0_18, %c0_19] : memref<1x8x2xf32, #tpu.memory_space<vmem>>, vector<1x8x2xf32>
    %24 = vector.shape_cast %23 : vector<1x8x2xf32> to vector<8x2xf32>
    %25 = vector.shape_cast %22 : vector<8x2xf32> to vector<1x8x2xf32>
    tpu.vector_store %arg8[%c0_17, %c0_18, %c0_19], %25 {strides = array<i32>} : memref<1x8x2xf32, #tpu.memory_space<vmem>>, vector<1x8x2xf32>,
    %26 = arith.truncf %16 : vector<8x256xf32> to vector<8x256xbf16>
    %c0_20 = arith.constant 0 : index
    %c0_21 = arith.constant 0 : index
    %27 = vector.load %arg7[%c0_20, %c0_21] : memref<8x256xbf16, #tpu.memory_space<vmem>>, vector<8x256xbf16>
    tpu.vector_store %arg7[%c0_20, %c0_21], %26 {strides = array<i32>} : memref<8x256xbf16, #tpu.memory_space<vmem>>, vector<8x256xbf16>,
    return
  }
  func.func @transform_0(%arg0: i32) -> (i32, i32) {
    %c0_i32 = arith.constant 0 : i32
    %c0_i32_0 = arith.constant 0 : i32
    %c0_i32_1 = arith.constant 0 : i32
    return %c0_i32, %c0_i32_0 : i32, i32
  }
  func.func @transform_1(%arg0: i32) -> (i32, i32) {
    %c0_i32 = arith.constant 0 : i32
    %c0_i32_0 = arith.constant 0 : i32
    return %c0_i32, %arg0 : i32, i32
  }
  func.func @transform_2(%arg0: i32) -> (i32, i32) {
    %c0_i32 = arith.constant 0 : i32
    %c0_i32_0 = arith.constant 0 : i32
    %c0_i32_1 = arith.constant 0 : i32
    return %c0_i32, %c0_i32_0 : i32, i32
  }
  func.func @transform_3(%arg0: i32) -> (i32, i32) {
    %c0_i32 = arith.constant 0 : i32
    %c0_i32_0 = arith.constant 0 : i32
    return %c0_i32, %arg0 : i32, i32
  }
  func.func @transform_4(%arg0: i32) -> (i32, i32) {
    %c0_i32 = arith.constant 0 : i32
    %c0_i32_0 = arith.constant 0 : i32
    return %c0_i32, %arg0 : i32, i32
  }
  func.func @transform_5(%arg0: i32) -> (i32, i32, i32) {
    %c0_i32 = arith.constant 0 : i32
    %c0_i32_0 = arith.constant 0 : i32
    %c0_i32_1 = arith.constant 0 : i32
    return %arg0, %c0_i32, %c0_i32_0 : i32, i32, i32
  }
  func.func @transform_6(%arg0: i32) -> (i32, i32) {
    %c0_i32 = arith.constant 0 : i32
    %c0_i32_0 = arith.constant 0 : i32
    return %c0_i32, %arg0 : i32, i32
  }
  func.func @transform_7(%arg0: i32) -> (i32, i32, i32) {
    %c0_i32 = arith.constant 0 : i32
    %c0_i32_0 = arith.constant 0 : i32
    %c0_i32_1 = arith.constant 0 : i32
    return %arg0, %c0_i32, %c0_i32_0 : i32, i32, i32
  }
}

module attributes {stable_mosaic.version = 11 : i64} {
  func.func @kernel(%arg0: i32, %arg1: memref<8x256xbf16, #tpu.memory_space<vmem>>, %arg2: memref<8x1xf32, #tpu.memory_space<vmem>>, %arg3: memref<8x1xf32, #tpu.memory_space<vmem>>, %arg4: memref<8x256xbf16, #tpu.memory_space<vmem>>, %arg5: memref<8x1xf32, #tpu.memory_space<vmem>>, %arg6: memref<8x1xf32, #tpu.memory_space<vmem>>, %arg7: memref<8x256xf32, #tpu.memory_space<vmem>>) attributes {dimension_semantics = [#tpu.dimension_semantics<parallel>], iteration_bounds = array<i64: 2>, scalar_prefetch = 0 : i64, scratch_operands = 0 : i64, tpu.core_type = #tpu.core_type<tc>, window_params = [{transform_indices = @transform_0, window_bounds = array<i64: 8, 256>}, {pipeline_mode = #tpu.pipeline_mode<synchronous>, transform_indices = @transform_1, window_bounds = array<i64: 8, 1>}, {pipeline_mode = #tpu.pipeline_mode<synchronous>, transform_indices = @transform_2, window_bounds = array<i64: 8, 1>}, {transform_indices = @transform_3, window_bounds = array<i64: 8, 256>}, {pipeline_mode = #tpu.pipeline_mode<synchronous>, transform_indices = @transform_4, window_bounds = array<i64: 8, 1>}, {pipeline_mode = #tpu.pipeline_mode<synchronous>, transform_indices = @transform_5, window_bounds = array<i64: 8, 1>}, {transform_indices = @transform_6, window_bounds = array<i64: 8, 256>}]} {
    %c0 = arith.constant 0 : index
    %c0_0 = arith.constant 0 : index
    %0 = vector.load %arg1[%c0, %c0_0] : memref<8x256xbf16, #tpu.memory_space<vmem>>, vector<8x256xbf16>
    %1 = arith.extf %0 : vector<8x256xbf16> to vector<8x256xf32>
    %c0_1 = arith.constant 0 : index
    %c0_2 = arith.constant 0 : index
    %2 = vector.load %arg2[%c0_1, %c0_2] : memref<8x1xf32, #tpu.memory_space<vmem>>, vector<8x1xf32>
    %c0_3 = arith.constant 0 : index
    %c0_4 = arith.constant 0 : index
    %3 = vector.load %arg3[%c0_3, %c0_4] : memref<8x1xf32, #tpu.memory_space<vmem>>, vector<8x1xf32>
    %4 = vector.broadcast %2 : vector<8x1xf32> to vector<8x256xf32>
    %5 = arith.mulf %1, %4 : vector<8x256xf32>
    %6 = vector.broadcast %3 : vector<8x1xf32> to vector<8x256xf32>
    %7 = arith.addf %5, %6 : vector<8x256xf32>
    %c0_5 = arith.constant 0 : index
    %c0_6 = arith.constant 0 : index
    %8 = vector.load %arg4[%c0_5, %c0_6] : memref<8x256xbf16, #tpu.memory_space<vmem>>, vector<8x256xbf16>
    %9 = arith.extf %8 : vector<8x256xbf16> to vector<8x256xf32>
    %c0_7 = arith.constant 0 : index
    %c0_8 = arith.constant 0 : index
    %10 = vector.load %arg5[%c0_7, %c0_8] : memref<8x1xf32, #tpu.memory_space<vmem>>, vector<8x1xf32>
    %c0_9 = arith.constant 0 : index
    %c0_10 = arith.constant 0 : index
    %11 = vector.load %arg6[%c0_9, %c0_10] : memref<8x1xf32, #tpu.memory_space<vmem>>, vector<8x1xf32>
    %12 = vector.broadcast %10 : vector<8x1xf32> to vector<8x256xf32>
    %13 = arith.mulf %9, %12 : vector<8x256xf32>
    %14 = vector.broadcast %11 : vector<8x1xf32> to vector<8x256xf32>
    %15 = arith.addf %13, %14 : vector<8x256xf32>
    %16 = arith.addf %7, %15 : vector<8x256xf32>
    %cst = arith.constant 0.000000e+00 : f32
    %17 = vector.broadcast %cst : f32 to vector<8x256xf32>
    %18 = arith.maximumf %16, %17 : vector<8x256xf32>
    %c0_11 = arith.constant 0 : index
    %c0_12 = arith.constant 0 : index
    %19 = vector.load %arg7[%c0_11, %c0_12] : memref<8x256xf32, #tpu.memory_space<vmem>>, vector<8x256xf32>
    tpu.vector_store %arg7[%c0_11, %c0_12], %18 {strides = array<i32>} : memref<8x256xf32, #tpu.memory_space<vmem>>, vector<8x256xf32>,
    return
  }
  func.func @transform_0(%arg0: i32) -> (i32, i32) {
    %c0_i32 = arith.constant 0 : i32
    %c0_i32_0 = arith.constant 0 : i32
    return %c0_i32, %arg0 : i32, i32
  }
  func.func @transform_1(%arg0: i32) -> (i32, i32) {
    %c0_i32 = arith.constant 0 : i32
    %c0_i32_0 = arith.constant 0 : i32
    %c0_i32_1 = arith.constant 0 : i32
    return %c0_i32, %c0_i32_0 : i32, i32
  }
  func.func @transform_2(%arg0: i32) -> (i32, i32) {
    %c0_i32 = arith.constant 0 : i32
    %c0_i32_0 = arith.constant 0 : i32
    %c0_i32_1 = arith.constant 0 : i32
    return %c0_i32, %c0_i32_0 : i32, i32
  }
  func.func @transform_3(%arg0: i32) -> (i32, i32) {
    %c0_i32 = arith.constant 0 : i32
    %c0_i32_0 = arith.constant 0 : i32
    return %c0_i32, %arg0 : i32, i32
  }
  func.func @transform_4(%arg0: i32) -> (i32, i32) {
    %c0_i32 = arith.constant 0 : i32
    %c0_i32_0 = arith.constant 0 : i32
    %c0_i32_1 = arith.constant 0 : i32
    return %c0_i32, %c0_i32_0 : i32, i32
  }
  func.func @transform_5(%arg0: i32) -> (i32, i32) {
    %c0_i32 = arith.constant 0 : i32
    %c0_i32_0 = arith.constant 0 : i32
    %c0_i32_1 = arith.constant 0 : i32
    return %c0_i32, %c0_i32_0 : i32, i32
  }
  func.func @transform_6(%arg0: i32) -> (i32, i32) {
    %c0_i32 = arith.constant 0 : i32
    %c0_i32_0 = arith.constant 0 : i32
    return %c0_i32, %arg0 : i32, i32
  }
}

</mosaic_0001>

<bundles_post_ra>
// kernel: residual_block_forward.5
= control target key start
LH: loop header
LB: loop body
LE: loop exit
PB: predicated region body
PF: predicated region fallthrough
CT: control target
= control target key end

     0   :  { %s312_s12 = smov 0   ;;  %s335_s0 = inlined_call_operand.vmem [shape: bf16[8,512], index: 0, kind: input, shape index: {}]   ;;  %s336_s1 = inlined_call_operand.vmem [shape: f32[8,1], index: 1, kind: input, shape index: {}]   ;;  %s337_s2 = inlined_call_operand.vmem [shape: f32[8,1], index: 2, kind: input, shape index: {}]   ;;  %s338_s3 = inlined_call_operand.vmem [shape: bf16[8,512], index: 3, kind: output, shape index: {}]  }
   0x1 LB: > { %s260_s13 = sadd.s32 4294967295, %s289_s12   ;;  %p264_p0 = scmp.ge.s32.totalorder %s289_s12, 1  ;;  %s289_s12 = sphi %s312_s12, %s13_s12  }
   0x2   : > { %p138_p1 = scmp.lt.s32.totalorder %s289_s12, 3 }
   0x4   : > { %p139_p2 = pnand %p264_p0, %p138_p1 }
   0x5   : > { %s265_s18 = sshll.u32 (!%p139_p2), %s260_s13, 1 }
   0x6   : > { %142 = sbr.rel (%p139_p2) target bundleno = 148 (0x94), region = 32  ;;  %p163_p3 = scmp.lt.s32.totalorder (!%p139_p2), %s265_s18, 3 }
   0xb   : > { %v177_v0 = vld [vmem:[%s336_s1] sm:$0xff]  ;;  %v291_v1 = vmov 0   ;;  %s340_s18 = smov (!%p163_p3, %s265_s18), 3 }
   0xc   : > { %282 = vset.pattern.permute.xlu0 %v291_v1  ;;  %v178_v2 = vld [vmem:[%s337_s2] sm:$0xff]  ;;  %s266_s19 = sshll.u32 %s340_s18, 2 }
   0xd   : > { %181 = vperm.xlu0 %282, %v177_v0   ;;  %s166_s22 = scalar_lea.vmem %s335_s0, %s266_s19  ;;  %s172_s25 = scalar_lea.vmem %s338_s3, %s266_s19 }
   0xe   : > { %v174_v3 = vld [vmem:[%s166_s22] sm:$0xff] }
   0xf   : > { %v175_v4 = vunpack.c.l.bf16 %v174_v3  ;;  %v176_v5 = vunpack.c.h.bf16 %v174_v3 }
  0x11   : > { %188 = vperm.xlu0 %282, %v178_v2  }
  0x88   : > { %v182_v6 = vpop.permute.xlu0 %181 }
  0x89   : > { %v184_v7 = vmul.f32 %v182_v6, %v175_v4  ;;  %v185_v8 = vmul.f32 %v182_v6, %v176_v5 }
  0x8c   : > { %v189_v9 = vpop.permute.xlu0 %188 }
  0x8d   : > { %v191_v10 = vadd.f32 %v189_v9, %v184_v7  ;;  %v192_v11 = vadd.f32 %v189_v9, %v185_v8 }
  0x8f   : > { %v193_v12 = vmax.f32 %v191_v10, 0.0  ;;  %v194_v13 = vmax.f32 %v192_v11, 0.0 }
  0x91   : > { %v272_v14 = vpack.c.bf16 %v194_v13, %v193_v12 }
  0x93   : > { %203 = vst [vmem:[%s172_s25] sm:$0xff] %v272_v14 }
  0x94 PF: > { %s13_s12 = sadd.s32 1, %s289_s12  }
  0x95   : > { %p10_p4 = scmp.ge.s32.totalorder %s13_s12, 4  }
  0x97   :  { %12 = sbr.rel (!%p10_p4) target bundleno = 1 (0x1), region = 62 }

// kernel: residual_block_forward.4
= control target key start
LH: loop header
LB: loop body
LE: loop exit
PB: predicated region body
PF: predicated region fallthrough
CT: control target
= control target key end

     0   :  { %s537_s12 = smov 0   ;;  %s539_s13 = smov 0   ;;  %s598_s0 = inlined_call_operand.vmem [shape: bf16[8,36], index: 0, kind: input, shape index: {}]   ;;  %s599_s1 = inlined_call_operand.vmem [shape: bf16[36,512], index: 1, kind: input, shape index: {}]   ;;  %s600_s2 = inlined_call_operand.vmem [shape: bf16[8,512], index: 2, kind: output, shape index: {0}]   ;;  %s601_s3 = inlined_call_operand.vmem [shape: f32[2,8,2], index: 3, kind: output, shape index: {1}]  }
   0x1   :  { %s541_s14 = smov 0  }
   0x2 LB: > { %s553_s15 = sadd.s32 4294967295, %s514_s14   ;;  %s556_s16 = sadd.s32 1, %s514_s14   ;;  %s514_s14 = sphi %s541_s14, %s604_s14   ;;  %s510_s13 = sphi %s539_s13, %s603_s13   ;;  %s506_s12 = sphi %s537_s12, %s602_s12  }
   0x3   : > { %s39_s17 = ssub.s32 %s514_s14, %s556_s16  ;;  %s42_s18 = sadd.s32 1, %s510_s13 }
   0x4   : > { %p40_p0 = scmp.eq.s32.totalorder %s39_s17, 0  ;;  %p49_p1 = scmp.ne.s32.totalorder %s510_s13, %s506_s12 }
   0x5   : > { %p50_p2 = scmp.eq.s32.totalorder %s514_s14, 0  ;;  %p437_p4 = scmp.ge.s32.totalorder %s514_s14, 2 }
   0x6   : > { %s565_s19 = scalar_select %p40_p0, %s510_s13, %s42_s18  }
   0x7   : > { %p51_p3 = por %p50_p2, %p49_p1  ;;  %130 = sbr.rel (%p437_p4) target bundleno = 19 (0x13), region = 20 }
   0xc   : > { %133 = sbr.rel (!%p51_p3) target bundleno = 19 (0x13), region = 24  ;;  %s135_s20 = sand.u32 (%p51_p3), 1, %s510_s13  }
   0xd   : > { %s455_s21 = sshll.u32 (%p51_p3), %s514_s14, 3  ;;  %s457_s22 = smul.u32 (%p51_p3), 40, %s135_s20 }
   0xe   : > { %s140_s25 = scalar_lea.vmem (%p51_p3), %s599_s1, %s455_s21 }
   0xf   : > { %v177_v0 = vld [vmem:[%s140_s25] sm:$0xff] (%p51_p3)  ;;  %v179_v1 = vld [vmem:[%s140_s25 + $0x10] sm:$0xff] (%p51_p3)  ;;  %s137_s26 = scalar_lea.vmem (%p51_p3), [#allocation2], %s457_s22 }
  0x10   : > { %v181_v2 = vld [vmem:[%s140_s25 + $0x20] sm:$0xff] (%p51_p3)  ;;  %v183_v3 = vld [vmem:[%s140_s25 + $0x30] sm:$0xff] (%p51_p3)  ;;  %178 = vst [vmem:[%s137_s26] sm:$0xff] (%p51_p3), %v177_v0  ;;  %180 = vst [vmem:[%s137_s26 + $0x8] sm:$0xff] (%p51_p3), %v179_v1 }
  0x11   : > { %v185_v4 = vld [vmem:[%s140_s25 + $0x40] sm:$0xff]  ;;  %182 = vst [vmem:[%s137_s26 + $0x10] sm:$0xff] %v181_v2  ;;  %184 = vst [vmem:[%s137_s26 + $0x18] sm:$0xff] %v183_v3 }
  0x12   : > { %186 = vst [vmem:[%s137_s26 + $0x20] sm:$0xff] %v185_v4 }
  0x13 PF: > { %p440_p5 = scmp.ge.s32.totalorder %s514_s14, 1  ;;  %p191_p6 = scmp.lt.s32.totalorder %s514_s14, 3 }
  0x15   : > { %p192_p7 = pnand %p440_p5, %p191_p6 }
  0x16   : > { %s198_s27 = sand.u32 (!%p192_p7), 1, %s506_s12   ;;  %s441_s5 = sshll.u32 (!%p192_p7), %s553_s15, 1 }
  0x17   : > { %195 = sbr.rel (%p192_p7) target bundleno = 384 (0x180), region = 62  ;;  %p227_p8 = scmp.lt.s32.totalorder (!%p192_p7), %s441_s5, 3 }
  0x18   : > { %s458_s28 = smul.u32 (!%p192_p7), 40, %s198_s27  ;;  %p232_p9 = scmp.lt.s32.totalorder (!%p192_p7), %s553_s15, 1 }
  0x1a   : > { %s200_s29 = scalar_lea.vmem (!%p192_p7), [#allocation2], %s458_s28 }
  0x1c   : > { %v516_v5 = vmov 0   ;;  %v242_v6 = vld [vmem:[%s200_s29 + $0x20] sm:$0x33]  ;;  %vm272_vm0 = vcmask 1041408   ;;  %v486_v9 = vld [vmem:[%s200_s29 + $0x14] ss:$8 sps:$4 sm:$0xff]  }
  0x1d   : > { %311 = vmatprep.mubr.bf16.mxu0 %v516_v5  ;;  %v449_v7 = vcombine.high %v242_v6, %v242_v6  ;;  %v448_v8 = vcombine.low %v242_v6, %v242_v6  ;;  %v488_v11 = vld [vmem:[%s200_s29 + $0x10] ss:$8 sps:$4 sm:$0xff]   ;;  %v489_v12 = vld [vmem:[%s200_s29 + $0x4] ss:$8 sps:$4 sm:$0xff]   ;;  %v491_v13 = vld [vmem:[%s200_s29] ss:$8 sps:$4 sm:$0xff]  }
  0x1e   : > { %v237_v14 = vld [vmem:[%s598_s0] sm:$0xf]  ;;  %vm268_vm1 = vcmask 293888   ;;  %s606_s5 = smov (!%p227_p8, %s441_s5), 3  ;;  %s608_s15 = smov (!%p232_p9, %s553_s15), 1  ;;  %vm328_vm2 = vcmask 7168  }
  0x1f   : > { %450 = vmatprep.subr.msk.bf16.mxu0 %vm272_vm0, %v449_v7  ;;  %v274_v10 = vsel %vm272_vm0, %v448_v8, 0  ;;  %s442_s6 = sshll.u32 %s606_s5, 2  ;;  %s443_s10 = sshll.u32 %s608_s15, 3  ;;  %vm330_vm3 = vcmask 15360  }
  0x20   : > { %290 = vmatpush1.bf16.msra.mxu0 %v274_v10  ;;  %s230_s9 = scalar_lea.vmem %s600_s2, %s442_s6  ;;  %s235_s14 = scalar_lea.vmem %s601_s3, %s443_s10 }
  0x21   : > { %291 = vmatprep.subr.bf16.mxu0 %v486_v9 }
  0x24   : > { %292 = vmatpush1.bf16.msra.mxu0 %v488_v11 }
  0x25   : > { %293 = vmatprep.subr.bf16.mxu0 %v489_v12 }
  0x28   : > { %294 = vmatpush1.bf16.msra.mxu0 %v491_v13 }
  0x2b   : > { %451 = vmatmul.mubr.msk.bf16.vlgmr.msra.gmra.mxu0 %vm268_vm1, %v237_v14 }
  0xeb   : > { %v313_v15 = vpop.f32.mrf.mxu0 }
  0xec   : > { %v323_v21 = vmul.f32 %v313_v15, %v313_v15 }
  0xed   : > { %v315_v16 = vpop.f32.mrf.mxu0 }
  0xee   : > { %v456_v17 = vpack.c.bf16 %v315_v16, %v313_v15  ;;  %v320_v18 = vadd.f32 %v315_v16, %v313_v15  ;;  %v324_v19 = vmul.f32 %v315_v16, %v315_v16 }
  0xef   : > { %v317_v20 = vpop.f32.mrf.mxu0 }
  0xf0   : > { %340 = vst [vmem:[%s230_s9] sm:$0xff] %v456_v17  ;;  %321 = vadd.xlane.f32.xlu0 %v320_v18  ;;  %v325_v23 = vadd.f32 %v324_v19, %v323_v21 }
  0xf1   : > { %v318_v22 = vpop.f32.mrf.mxu0 }
  0xf4   : > { %326 = vadd.xlane.f32.xlu0 %v325_v23 }
 0x179   : > { %v322_v24 = vpop.xlane.xlu0 %321 }
 0x17d   : > { %v327_v25 = vpop.xlane.xlu0 %326 }
 0x17e   : > { %v329_v26 = vsel %vm328_vm2, %v322_v24, %v327_v25 }
 0x17f   : > { %331 = vst.msk [vmem:[%s235_s14] sm:$0xff] %vm330_vm3, %v329_v26 }
 0x180 PF: > { %p11_p10 = scmp.ge.s32.totalorder %s556_s16, 4   ;;  %s602_s12 = smov %s510_s13 }
 0x181   : > { %s603_s13 = smov %s565_s19  ;;  %s604_s14 = smov %s556_s16 }
 0x182   :  { %13 = sbr.rel (!%p11_p10) target bundleno = 2 (0x2), region = 113 }

// kernel: residual_block_forward.7
= control target key start
LH: loop header
LB: loop body
LE: loop exit
PB: predicated region body
PF: predicated region fallthrough
CT: control target
= control target key end

     0   :  { %s457_s21 = smov 0   ;;  %s489_s0 = inlined_call_operand.vmem [shape: bf16[8,512], index: 0, kind: input, shape index: {}]   ;;  %s490_s1 = inlined_call_operand.vmem [shape: f32[8,1], index: 1, kind: input, shape index: {}]   ;;  %s491_s2 = inlined_call_operand.vmem [shape: f32[8,1], index: 2, kind: input, shape index: {}]   ;;  %s492_s3 = inlined_call_operand.vmem [shape: bf16[8,512], index: 3, kind: input, shape index: {}]   ;;  %s493_s4 = inlined_call_operand.vmem [shape: f32[8,1], index: 4, kind: input, shape index: {}]   ;;  %s494_s5 = inlined_call_operand.vmem [shape: f32[8,1], index: 5, kind: input, shape index: {}]   ;;  %s495_s6 = inlined_call_operand.vmem [shape: f32[8,512], index: 6, kind: output, shape index: {}]  }
   0x1 LB: > { %s389_s22 = sadd.s32 4294967295, %s419_s21   ;;  %p393_p0 = scmp.ge.s32.totalorder %s419_s21, 1  ;;  %s419_s21 = sphi %s457_s21, %s16_s21  }
   0x2   : > { %p224_p1 = scmp.lt.s32.totalorder %s419_s21, 3 }
   0x4   : > { %p225_p2 = pnand %p393_p0, %p224_p1 }
   0x5   : > { %s394_s7 = sshll.u32 (!%p225_p2), %s389_s22, 1 }
   0x6   : > { %228 = sbr.rel (%p225_p2) target bundleno = 150 (0x96), region = 44  ;;  %p260_p3 = scmp.lt.s32.totalorder (!%p225_p2), %s394_s7, 3 }
   0xb   : > { %v281_v0 = vld [vmem:[%s491_s2] sm:$0xff]  ;;  %v421_v2 = vmov 0   ;;  %s497_s7 = smov (!%p260_p3, %s394_s7), 3 }
   0xc   : > { %v280_v1 = vld [vmem:[%s490_s1] sm:$0xff]  ;;  %412 = vset.pattern.permute.xlu1 %v421_v2  ;;  %411 = vset.pattern.permute.xlu0 %v421_v2  ;;  %s395_s8 = sshll.u32 %s497_s7, 2  ;;  %s399_s15 = sshll.u32 %s497_s7, 3 }
   0xd   : > { %291 = vperm.xlu1 %412, %v281_v0   ;;  %284 = vperm.xlu0 %411, %v280_v1   ;;  %v300_v3 = vld [vmem:[%s494_s5] sm:$0xff]  ;;  %s263_s11 = scalar_lea.vmem %s489_s0, %s395_s8  ;;  %s269_s14 = scalar_lea.vmem %s492_s3, %s395_s8 }
   0xe   : > { %v299_v4 = vld [vmem:[%s493_s4] sm:$0xff]  ;;  %s275_s18 = scalar_lea.vmem %s495_s6, %s399_s15 }
   0xf   : > { %v277_v5 = vld [vmem:[%s263_s11] sm:$0xff] }
  0x10   : > { %v296_v6 = vld [vmem:[%s269_s14] sm:$0xff]  ;;  %v278_v7 = vunpack.c.l.bf16 %v277_v5  ;;  %v279_v8 = vunpack.c.h.bf16 %v277_v5 }
  0x11   : > { %310 = vperm.xlu1 %412, %v300_v3   ;;  %303 = vperm.xlu0 %411, %v299_v4   ;;  %v297_v11 = vunpack.c.l.bf16 %v296_v6  ;;  %v298_v12 = vunpack.c.h.bf16 %v296_v6 }
  0x88   : > { %v292_v9 = vpop.permute.xlu1 %291  ;;  %v285_v10 = vpop.permute.xlu0 %284 }
  0x89   : > { %v287_v13 = vmul.f32 %v285_v10, %v278_v7  ;;  %v288_v14 = vmul.f32 %v285_v10, %v279_v8 }
  0x8b   : > { %v294_v19 = vadd.f32 %v292_v9, %v287_v13  ;;  %v295_v20 = vadd.f32 %v292_v9, %v288_v14 }
  0x8c   : > { %v304_v15 = vpop.permute.xlu0 %303  ;;  %v311_v18 = vpop.permute.xlu1 %310 }
  0x8d   : > { %v306_v16 = vmul.f32 %v304_v15, %v297_v11  ;;  %v307_v17 = vmul.f32 %v304_v15, %v298_v12 }
  0x8f   : > { %v313_v21 = vadd.f32 %v311_v18, %v306_v16  ;;  %v314_v22 = vadd.f32 %v311_v18, %v307_v17 }
  0x91   : > { %v315_v23 = vadd.f32 %v313_v21, %v294_v19  ;;  %v316_v24 = vadd.f32 %v314_v22, %v295_v20 }
  0x93   : > { %v317_v25 = vmax.f32 %v315_v23, 0.0  ;;  %v318_v26 = vmax.f32 %v316_v24, 0.0 }
  0x95   : > { %319 = vst [vmem:[%s275_s18] sm:$0xff] %v317_v25  ;;  %320 = vst [vmem:[%s275_s18 + $0x8] sm:$0xff] %v318_v26 }
  0x96 PF: > { %s16_s21 = sadd.s32 1, %s419_s21  }
  0x97   : > { %p13_p4 = scmp.ge.s32.totalorder %s16_s21, 4  }
  0x99   :  { %15 = sbr.rel (!%p13_p4) target bundleno = 1 (0x1), region = 77 }

// kernel: residual_block_forward.6
= control target key start
LH: loop header
LB: loop body
LE: loop exit
PB: predicated region body
PF: predicated region fallthrough
CT: control target
= control target key end

     0   :  { %s929_s24 = smov 0   ;;  %s931_s25 = smov 0   ;;  %s1017_s0 = inlined_call_operand.vmem [shape: bf16[8,72], index: 0, kind: input, shape index: {}]   ;;  %s1018_s1 = inlined_call_operand.vmem [shape: bf16[72,512], index: 1, kind: input, shape index: {}]   ;;  %s1019_s2 = inlined_call_operand.vmem [shape: bf16[8,4], index: 2, kind: input, shape index: {}]   ;;  %s1020_s3 = inlined_call_operand.vmem [shape: bf16[4,512], index: 3, kind: input, shape index: {}]   ;;  %s1021_s4 = inlined_call_operand.vmem [shape: bf16[8,512], index: 4, kind: output, shape index: {0}]   ;;  %s1022_s5 = inlined_call_operand.vmem [shape: f32[2,8,2], index: 5, kind: output, shape index: {1}]   ;;  %s1023_s6 = inlined_call_operand.vmem [shape: bf16[8,512], index: 6, kind: output, shape index: {2}]   ;;  %s1024_s7 = inlined_call_operand.vmem [shape: f32[2,8,2], index: 7, kind: output, shape index: {3}]  }
   0x1   :  { %s933_s26 = smov 0  }
   0x2 LB: > { %s945_s27 = sadd.s32 4294967295, %s886_s26   ;;  %s948_s28 = sadd.s32 1, %s886_s26   ;;  %s886_s26 = sphi %s933_s26, %s1027_s26   ;;  %s882_s25 = sphi %s931_s25, %s1026_s25   ;;  %s878_s24 = sphi %s929_s24, %s1025_s24  }
   0x3   : > { %s43_s29 = ssub.s32 %s886_s26, %s948_s28  ;;  %s46_s30 = sadd.s32 1, %s882_s25 }
   0x4   : > { %p44_p0 = scmp.eq.s32.totalorder %s43_s29, 0  ;;  %p53_p1 = scmp.ne.s32.totalorder %s882_s25, %s878_s24 }
   0x5   : > { %p54_p2 = scmp.eq.s32.totalorder %s886_s26, 0  ;;  %p789_p4 = scmp.ge.s32.totalorder %s886_s26, 2 }
   0x6   : > { %s957_s8 = scalar_select %p44_p0, %s882_s25, %s46_s30  }
   0x7   : > { %p55_p3 = por %p54_p2, %p53_p1  ;;  %236 = sbr.rel (%p789_p4) target bundleno = 21 (0x15), region = 24 }
   0xc   : > { %239 = sbr.rel (!%p55_p3) target bundleno = 21 (0x15), region = 28  ;;  %s241_s9 = sand.u32 (%p55_p3), 1, %s882_s25  }
   0xd   : > { %s820_s10 = sshll.u32 (%p55_p3), %s886_s26, 3  ;;  %s823_s11 = smul.u32 (%p55_p3), 72, %s241_s9 }
   0xe   : > { %s246_s14 = scalar_lea.vmem (%p55_p3), %s1018_s1, %s820_s10 }
   0xf   : > { %v291_v0 = vld [vmem:[%s246_s14] sm:$0xff] (%p55_p3)  ;;  %v293_v1 = vld [vmem:[%s246_s14 + $0x10] sm:$0xff] (%p55_p3)  ;;  %s243_s15 = scalar_lea.vmem (%p55_p3), [#allocation2], %s823_s11 }
  0x10   : > { %v295_v2 = vld [vmem:[%s246_s14 + $0x20] sm:$0xff] (%p55_p3)  ;;  %v297_v3 = vld [vmem:[%s246_s14 + $0x30] sm:$0xff] (%p55_p3)  ;;  %292 = vst [vmem:[%s243_s15] sm:$0xff] (%p55_p3), %v291_v0  ;;  %294 = vst [vmem:[%s243_s15 + $0x8] sm:$0xff] (%p55_p3), %v293_v1 }
  0x11   : > { %v299_v4 = vld [vmem:[%s246_s14 + $0x40] sm:$0xff]  ;;  %v301_v5 = vld [vmem:[%s246_s14 + $0x50] sm:$0xff]  ;;  %296 = vst [vmem:[%s243_s15 + $0x10] sm:$0xff] %v295_v2  ;;  %298 = vst [vmem:[%s243_s15 + $0x18] sm:$0xff] %v297_v3 }
  0x12   : > { %300 = vst [vmem:[%s243_s15 + $0x20] sm:$0xff] %v299_v4  ;;  %302 = vst [vmem:[%s243_s15 + $0x28] sm:$0xff] %v301_v5  ;;  %v303_v6 = vld [vmem:[%s246_s14 + $0x60] sm:$0xff]  ;;  %v305_v7 = vld [vmem:[%s246_s14 + $0x70] sm:$0xff] }
  0x13   : > { %v307_v8 = vld [vmem:[%s246_s14 + $0x80] sm:$0xff]  ;;  %304 = vst [vmem:[%s243_s15 + $0x30] sm:$0xff] %v303_v6  ;;  %306 = vst [vmem:[%s243_s15 + $0x38] sm:$0xff] %v305_v7 }
  0x14   : > { %308 = vst [vmem:[%s243_s15 + $0x40] sm:$0xff] %v307_v8 }
  0x15 PF: > { %p792_p5 = scmp.ge.s32.totalorder %s886_s26, 1  ;;  %p322_p6 = scmp.lt.s32.totalorder %s886_s26, 3 }
  0x17   : > { %p323_p7 = pnand %p792_p5, %p322_p6 }
  0x18   : > { %s329_s16 = sand.u32 (!%p323_p7), 1, %s878_s24   ;;  %s793_s17 = sshll.u32 (!%p323_p7), %s945_s27, 1 }
  0x19   : > { %326 = sbr.rel (%p323_p7) target bundleno = 394 (0x18a), region = 70  ;;  %p380_p8 = scmp.lt.s32.totalorder (!%p323_p7), %s793_s17, 3 }
  0x1a   : > { %s824_s18 = smul.u32 (!%p323_p7), 72, %s329_s16  ;;  %p391_p9 = scmp.lt.s32.totalorder (!%p323_p7), %s945_s27, 1 }
  0x1c   : > { %s969_s19 = scalar_lea.vmem (!%p323_p7), [#allocation2], %s824_s18 }
  0x1e   : > { %v888_v9 = vmov 0   ;;  %v415_v10 = vld [vmem:[%s969_s19 + $0x40] sm:$0xff]  ;;  %vm465_vm0 = vcmask 1043456   ;;  %s1029_s17 = smov (!%p380_p8, %s793_s17), 3  ;;  %v852_v13 = vld [vmem:[%s969_s19 + $0x34] ss:$8 sps:$4 sm:$0xff]  }
  0x1f   : > { %588 = vmatprep.mubr.bf16.mxu1 %v888_v9  ;;  %504 = vmatprep.mubr.bf16.mxu0 %v888_v9  ;;  %v810_v11 = vcombine.high %v415_v10, %v415_v10  ;;  %v809_v12 = vcombine.low %v415_v10, %v415_v10  ;;  %s794_s20 = sshll.u32 %s1029_s17, 1  ;;  %vm549_vm1 = vcmask 1041408   ;;  %v854_v15 = vld [vmem:[%s969_s19 + $0x30] ss:$8 sps:$4 sm:$0xff]   ;;  %v855_v17 = vld [vmem:[%s969_s19 + $0x24] ss:$8 sps:$4 sm:$0xff]  }
  0x20   : > { %s383_s23 = scalar_lea.vmem %s1020_s3, %s794_s20  ;;  %v857_v20 = vld [vmem:[%s969_s19 + $0x20] ss:$8 sps:$4 sm:$0xff]   ;;  %vm545_vm2 = vcmask 31744   ;;  %v858_v22 = vld [vmem:[%s969_s19 + $0x14] ss:$8 sps:$4 sm:$0xff]   ;;  %vm461_vm3 = vcmask 588800  }
  0x21   : > { %811 = vmatprep.subr.msk.bf16.mxu0 %vm465_vm0, %v810_v11  ;;  %v467_v14 = vsel %vm465_vm0, %v809_v12, 0  ;;  %v814_v16 = vld.sshfl [vmem:[%s383_s23] sm:$0x33 pattern:$0x76325410]  ;;  %s796_s9 = sshll.u32 %s1029_s17, 2 }
  0x22   : > { %479 = vmatpush1.bf16.msra.mxu0 %v467_v14  ;;  %v544_v18 = vcombine.high %v814_v16, %v814_v16  ;;  %v551_v19 = vsel %vm549_vm1, %v814_v16, 0  ;;  %v534_v21 = vld [vmem:[%s1019_s2] sm:$0xf]  ;;  %v861_v24 = vld [vmem:[%s969_s19 + $0x4] ss:$8 sps:$4 sm:$0xff]   ;;  %s399_s12 = scalar_lea.vmem %s1023_s6, %s796_s9  ;;  %s389_s15 = scalar_lea.vmem %s1021_s4, %s796_s9  ;;  %vm521_vm4 = vcmask 7168  }
  0x23   : > { %480 = vmatprep.subr.bf16.mxu0 %v852_v13  ;;  %v860_v23 = vld [vmem:[%s969_s19 + $0x10] ss:$8 sps:$4 sm:$0xff]   ;;  %v863_v25 = vld [vmem:[%s969_s19] ss:$8 sps:$4 sm:$0xff]   ;;  %s1031_s27 = smov (!%p391_p9, %s945_s27), 1  ;;  %vm523_vm5 = vcmask 15360  }
  0x24   : > { %815 = vmatprep.subr.msk.bf16.mxu1 %vm549_vm1, %v544_v18  ;;  %v406_v26 = vld [vmem:[%s1017_s0] sm:$0xf]  ;;  %s797_s16 = sshll.u32 %s1031_s27, 3 }
  0x25   : > { %571 = vmatpush1.bf16.msra.mxu1 %v551_v19  ;;  %s404_s19 = scalar_lea.vmem %s1024_s7, %s797_s16  ;;  %s394_s22 = scalar_lea.vmem %s1022_s5, %s797_s16 }
  0x26   : > { %481 = vmatpush1.bf16.msra.mxu0 %v854_v15 }
  0x27   : > { %482 = vmatprep.subr.bf16.mxu0 %v855_v17 }
  0x28   : > { %816 = vmatmul.mubr.msk.bf16.vlgmr.msra.gmra.mxu1 %vm545_vm2, %v534_v21 }
  0x2a   : > { %483 = vmatpush1.bf16.msra.mxu0 %v857_v20 }
  0x2b   : > { %484 = vmatprep.subr.bf16.mxu0 %v858_v22 }
  0x2e   : > { %485 = vmatpush1.bf16.msra.mxu0 %v860_v23 }
  0x2f   : > { %486 = vmatprep.subr.bf16.mxu0 %v861_v24 }
  0x32   : > { %487 = vmatpush1.bf16.msra.mxu0 %v863_v25 }
  0x35   : > { %812 = vmatmul.mubr.msk.bf16.vlgmr.msra.gmra.mxu0 %vm461_vm3, %v406_v26 }
  0xe8   : > { %v590_v27 = vpop.f32.mrf.mxu1 }
  0xe9   : > { %v600_v28 = vmul.f32 %v590_v27, %v590_v27 }
  0xea   : > { %v592_v29 = vpop.f32.mrf.mxu1 }
  0xeb   : > { %v822_v30 = vpack.c.bf16 %v592_v29, %v590_v27  ;;  %v597_v31 = vadd.f32 %v592_v29, %v590_v27  ;;  %v601_v32 = vmul.f32 %v592_v29, %v592_v29 }
  0xec   : > { %v594_v33 = vpop.f32.mrf.mxu1 }
  0xed   : > { %615 = vst [vmem:[%s399_s12] sm:$0xff] %v822_v30  ;;  %598 = vadd.xlane.f32.xlu1 %v597_v31  ;;  %v602_v34 = vadd.f32 %v601_v32, %v600_v28 }
  0xee   : > { %v595_v35 = vpop.f32.mrf.mxu1 }
  0xf1   : > { %603 = vadd.xlane.f32.xlu1 %v602_v34 }
  0xf5   : > { %v506_v36 = vpop.f32.mrf.mxu0 }
  0xf6   : > { %v516_v42 = vmul.f32 %v506_v36, %v506_v36 }
  0xf7   : > { %v508_v37 = vpop.f32.mrf.mxu0 }
  0xf8   : > { %v821_v38 = vpack.c.bf16 %v508_v37, %v506_v36  ;;  %v513_v39 = vadd.f32 %v508_v37, %v506_v36  ;;  %v517_v40 = vmul.f32 %v508_v37, %v508_v37 }
  0xf9   : > { %v510_v41 = vpop.f32.mrf.mxu0 }
  0xfa   : > { %533 = vst [vmem:[%s389_s15] sm:$0xff] %v821_v38  ;;  %514 = vadd.xlane.f32.xlu0 %v513_v39  ;;  %v518_v44 = vadd.f32 %v517_v40, %v516_v42 }
  0xfb   : > { %v511_v43 = vpop.f32.mrf.mxu0 }
  0xfe   : > { %519 = vadd.xlane.f32.xlu0 %v518_v44 }
 0x176   : > { %v599_v45 = vpop.xlane.xlu1 %598 }
 0x17a   : > { %v604_v46 = vpop.xlane.xlu1 %603 }
 0x17b   : > { %v605_v47 = vsel %vm521_vm4, %v599_v45, %v604_v46 }
 0x17c   : > { %606 = vst.msk [vmem:[%s404_s19] sm:$0xff] %vm523_vm5, %v605_v47 }
 0x183   : > { %v515_v48 = vpop.xlane.xlu0 %514 }
 0x187   : > { %v520_v49 = vpop.xlane.xlu0 %519 }
 0x188   : > { %v522_v50 = vsel %vm521_vm4, %v515_v48, %v520_v49 }
 0x189   : > { %524 = vst.msk [vmem:[%s394_s22] sm:$0xff] %vm523_vm5, %v522_v50 }
 0x18a PF: > { %p15_p10 = scmp.ge.s32.totalorder %s948_s28, 4   ;;  %s1025_s24 = smov %s882_s25 }
 0x18b   : > { %s1026_s25 = smov %s957_s8  ;;  %s1027_s26 = smov %s948_s28 }
 0x18c   :  { %17 = sbr.rel (!%p15_p10) target bundleno = 2 (0x2), region = 148 }

</bundles_post_ra>
